<compile_context>
chip_gen: v7x
topology: tpu7x:2x2x1
jax: 0.10.0
libtpu: 0.0.40
codegen_flags: <defaults>
</compile_context>

<pallas_src>
import functools

import jax
import jax.numpy as jnp
from jax.experimental import pallas as pl
from jax.experimental.pallas import tpu as pltpu

_H1 = 120
_H2 = 80
_HPAD = 128          # hidden width padded to the 128-lane boundary
_MAX_TILE_B = 2048   # batch rows per grid step (multiple of 16 -> bf16 sublane friendly)


def _round_up(n, m):
    return (n + m - 1) // m * m


def _choose_tile(batch, in_dim):
    """Pick the batch tile: big (amortize ~0.35us/step), VMEM-safe, TC-balanced."""
    # VMEM guard (v5e 16 MiB scoped default): x is double-buffered at
    # tile_b * in_dim * 4B.  Keep that under ~8 MiB, leaving headroom for the
    # lane-padded output buffers, weights and f32/bf16 intermediates.
    cap_rows = (8 << 20) // max(1, 2 * in_dim * 4)
    max_tile = max(16, min(_MAX_TILE_B, (cap_rows // 16) * 16))
    if batch >= 32:
        # An even number of >= 2 grid steps so v7x's two TensorCores both get
        # work under dimension_semantics=("parallel",).  No-op on v5e/v6e.
        num_tiles = 2 * max(1, pl.cdiv(batch, 2 * max_tile))
    else:
        num_tiles = 1
    tile_b = min(max_tile, _round_up(pl.cdiv(batch, num_tiles), 16))
    grid_len = pl.cdiv(batch, tile_b)
    return tile_b, grid_len


def _mlp_kernel(x_ref, w1_ref, b1_ref, w2_ref, b2_ref, w3_ref, b3_ref, o_ref):
    # Cast f32 x -> bf16 on the VPU (hidden under the MXU work).
    x = x_ref[...].astype(jnp.bfloat16)                                 # (Tb, in)
    h1 = jnp.dot(x, w1_ref[...], preferred_element_type=jnp.float32)   # MXU, f32 acc
    h1 = jnp.maximum(h1 + b1_ref[...], 0.0)
    h2 = jnp.dot(h1.astype(jnp.bfloat16), w2_ref[...],
                 preferred_element_type=jnp.float32)
    h2 = jnp.maximum(h2 + b2_ref[...], 0.0)
    # Layer 3 has a single output column: VPU multiply + XLU lane reduction
    # instead of a 1-lane MXU matmul.  Stays in f32.
    y = jnp.sum(h2 * w3_ref[...], axis=-1, keepdims=True) + b3_ref[...]
    o_ref[...] = y.astype(o_ref.dtype)


def prepare_params(params):
    """One-time padding/cast of GW_network params for the fused kernel.

    w1/w2 -> bf16 with hidden dims padded to 128; b1/b2 -> f32 (1, 128);
    w3 -> f32 (1, 128) row (consumed by the VPU, not the MXU); b3 -> f32 (1, 1).
    Zero padding is exact: padded weight rows/cols are zero and ReLU(0) = 0.
    """
    w1, b1, w2, b2, w3, b3 = params
    w1p = jnp.pad(w1, ((0, 0), (0, _HPAD - w1.shape[1]))).astype(jnp.bfloat16)
    b1p = jnp.pad(b1, ((0, 0), (0, _HPAD - b1.shape[1]))).astype(jnp.float32)
    w2p = jnp.pad(w2, ((0, _HPAD - w2.shape[0]),
                       (0, _HPAD - w2.shape[1]))).astype(jnp.bfloat16)
    b2p = jnp.pad(b2, ((0, 0), (0, _HPAD - b2.shape[1]))).astype(jnp.float32)
    w3p = jnp.pad(w3, ((0, _HPAD - w3.shape[0]), (0, 0))).astype(jnp.float32).T
    b3p = b3.astype(jnp.float32).reshape(1, 1)
    return (w1p, b1p, w2p, b2p, w3p, b3p)


@jax.jit
def gw_network_forward(x, padded_params):
    """Fused forward pass.  x: (batch, input_size) f32; params from prepare_params."""
    w1p, b1p, w2p, b2p, w3p, b3p = padded_params
    batch, in_dim = x.shape
    tile_b, grid_len = _choose_tile(batch, in_dim)

    rows_eff = grid_len * tile_b
    flops = 2 * rows_eff * (in_dim * _HPAD + _HPAD * _HPAD + _HPAD)
    bytes_accessed = (batch * in_dim * 4                               # x (f32)
                      + (in_dim * _HPAD + _HPAD * _HPAD) * 2           # weights (bf16)
                      + (3 * _HPAD + 1) * 4                            # b1/b2/w3row/b3 (f32)
                      + batch * 4)                                     # output (f32)

    return pl.pallas_call(
        _mlp_kernel,
        out_shape=jax.ShapeDtypeStruct((batch, 1), jnp.float32),
        grid_spec=pltpu.PrefetchScalarGridSpec(
            num_scalar_prefetch=0,
            grid=(grid_len,),
            in_specs=[
                pl.BlockSpec((tile_b, in_dim), lambda i: (i, 0)),   # x: streamed (f32)
                pl.BlockSpec((in_dim, _HPAD), lambda i: (0, 0)),    # W1: VMEM-resident
                pl.BlockSpec((1, _HPAD), lambda i: (0, 0)),         # b1
                pl.BlockSpec((_HPAD, _HPAD), lambda i: (0, 0)),     # W2
                pl.BlockSpec((1, _HPAD), lambda i: (0, 0)),         # b2
                pl.BlockSpec((1, _HPAD), lambda i: (0, 0)),         # w3 row (VPU)
                pl.BlockSpec((1, 1), lambda i: (0, 0)),             # b3
            ],
            out_specs=pl.BlockSpec((tile_b, 1), lambda i: (i, 0)),
        ),
        compiler_params=pltpu.CompilerParams(
            dimension_semantics=("parallel",),
        ),
        cost_estimate=pl.CostEstimate(
            flops=flops, transcendentals=0, bytes_accessed=bytes_accessed),
    )(x, w1p, b1p, w2p, b2p, w3p, b3p)


def init_params(key, input_size):
    """PyTorch default Linear init: U(-1/sqrt(fan_in), 1/sqrt(fan_in)).
    Weights stored as (in_features, out_features); biases as (1, out)."""
    dims = [(input_size, _H1), (_H1, _H2), (_H2, 1)]
    params = []
    for fan_in, fan_out in dims:
        key, kw, kb = jax.random.split(key, 3)
        bound = 1.0 / (fan_in ** 0.5)
        w = jax.random.uniform(kw, (fan_in, fan_out), jnp.float32, -bound, bound)
        b = jax.random.uniform(kb, (1, fan_out), jnp.float32, -bound, bound)
        params += [w, b]
    return tuple(params)


def reference_forward_f32(x, params):
    w1, b1, w2, b2, w3, b3 = params
    h1 = jnp.maximum(x @ w1 + b1, 0.0)
    h2 = jnp.maximum(h1 @ w2 + b2, 0.0)
    return h2 @ w3 + b3


def reference_forward_kernel_numerics(x, params):
    """Matches the kernel: bf16 operands for layers 1-2 (f32 accum), f32 layer 3."""
    w1, b1, w2, b2, w3, b3 = params
    c = lambda a: a.astype(jnp.bfloat16).astype(jnp.float32)
    h1 = jnp.maximum(c(x) @ c(w1) + b1, 0.0)
    h2 = jnp.maximum(c(h1) @ c(w2) + b2, 0.0)
    return h2 @ w3 + b3


if __name__ == "__main__":
    key = jax.random.PRNGKey(0)
    input_size = 20
    key, kp = jax.random.split(key)
    raw_params = init_params(kp, input_size)
    padded_params = prepare_params(raw_params)

    # Small single-tile case + a multi-tile case with a ragged tail (1000 rows,
    # two 512-row grid steps, last block partially masked).
    for batch in (8, 1000):
        key, kx = jax.random.split(key)
        x = jax.random.normal(kx, (batch, input_size), jnp.float32)

        out = jax.block_until_ready(gw_network_forward(x, padded_params))
        assert out.shape == (batch, 1), out.shape

        ref_k = reference_forward_kernel_numerics(x, raw_params)
        assert jnp.allclose(out, ref_k, atol=1e-2, rtol=1e-2), (
            f"mismatch vs kernel-numerics reference (batch={batch})")

        ref_f32 = reference_forward_f32(x, raw_params)
        assert jnp.allclose(out, ref_f32, atol=5e-2, rtol=5e-2), (
            f"mismatch vs f32 reference (batch={batch})")

    print("KERNEL_OK")
</pallas_src>

<mosaic_0001>
module attributes {stable_mosaic.version = 11 : i64} {
  func.func @_mlp_kernel(%arg0: i32, %arg1: memref<16x20xf32, #tpu.memory_space<vmem>>, %arg2: memref<20x128xbf16, #tpu.memory_space<vmem>>, %arg3: memref<1x128xf32, #tpu.memory_space<vmem>>, %arg4: memref<128x128xbf16, #tpu.memory_space<vmem>>, %arg5: memref<1x128xf32, #tpu.memory_space<vmem>>, %arg6: memref<1x128xf32, #tpu.memory_space<vmem>>, %arg7: memref<1x1xf32, #tpu.memory_space<vmem>>, %arg8: memref<16x1xf32, #tpu.memory_space<vmem>>) attributes {dimension_semantics = [#tpu.dimension_semantics<parallel>], iteration_bounds = array<i64: 1>, scalar_prefetch = 0 : i64, scratch_operands = 0 : i64, tpu.core_type = #tpu.core_type<tc>, window_params = [{transform_indices = @transform_0, window_bounds = array<i64: 16, 20>}, {pipeline_mode = #tpu.pipeline_mode<synchronous>, transform_indices = @transform_1, window_bounds = array<i64: 20, 128>}, {pipeline_mode = #tpu.pipeline_mode<synchronous>, transform_indices = @transform_2, window_bounds = array<i64: 1, 128>}, {pipeline_mode = #tpu.pipeline_mode<synchronous>, transform_indices = @transform_3, window_bounds = array<i64: 128, 128>}, {pipeline_mode = #tpu.pipeline_mode<synchronous>, transform_indices = @transform_4, window_bounds = array<i64: 1, 128>}, {pipeline_mode = #tpu.pipeline_mode<synchronous>, transform_indices = @transform_5, window_bounds = array<i64: 1, 128>}, {pipeline_mode = #tpu.pipeline_mode<synchronous>, transform_indices = @transform_6, window_bounds = array<i64: 1, 1>}, {transform_indices = @transform_7, window_bounds = array<i64: 16, 1>}]} {
    %c0 = arith.constant 0 : index
    %c0_0 = arith.constant 0 : index
    %0 = vector.load %arg1[%c0, %c0_0] : memref<16x20xf32, #tpu.memory_space<vmem>>, vector<16x20xf32>
    %1 = arith.truncf %0 : vector<16x20xf32> to vector<16x20xbf16>
    %c0_1 = arith.constant 0 : index
    %c0_2 = arith.constant 0 : index
    %2 = vector.load %arg2[%c0_1, %c0_2] : memref<20x128xbf16, #tpu.memory_space<vmem>>, vector<20x128xbf16>
    %cst = arith.constant dense<0.000000e+00> : vector<16x128xf32>
    %3 = tpu.matmul %1, %2, %cst {dimension_numbers = #tpu.dot_dimension_numbers<[1], [0], [0], [1], [0, 0, 1, 1], [], []>} : vector<16x20xbf16>, vector<20x128xbf16>, vector<16x128xf32> -> vector<16x128xf32>
    %c0_3 = arith.constant 0 : index
    %c0_4 = arith.constant 0 : index
    %4 = vector.load %arg3[%c0_3, %c0_4] : memref<1x128xf32, #tpu.memory_space<vmem>>, vector<1x128xf32>
    %5 = vector.broadcast %4 : vector<1x128xf32> to vector<16x128xf32>
    %6 = arith.addf %3, %5 : vector<16x128xf32>
    %cst_5 = arith.constant 0.000000e+00 : f32
    %7 = vector.broadcast %cst_5 : f32 to vector<16x128xf32>
    %8 = arith.maximumf %6, %7 : vector<16x128xf32>
    %9 = arith.truncf %8 : vector<16x128xf32> to vector<16x128xbf16>
    %c0_6 = arith.constant 0 : index
    %c0_7 = arith.constant 0 : index
    %10 = vector.load %arg4[%c0_6, %c0_7] : memref<128x128xbf16, #tpu.memory_space<vmem>>, vector<128x128xbf16>
    %cst_8 = arith.constant dense<0.000000e+00> : vector<16x128xf32>
    %11 = tpu.matmul %9, %10, %cst_8 {dimension_numbers = #tpu.dot_dimension_numbers<[1], [0], [0], [1], [0, 0, 1, 1], [], []>} : vector<16x128xbf16>, vector<128x128xbf16>, vector<16x128xf32> -> vector<16x128xf32>
    %c0_9 = arith.constant 0 : index
    %c0_10 = arith.constant 0 : index
    %12 = vector.load %arg5[%c0_9, %c0_10] : memref<1x128xf32, #tpu.memory_space<vmem>>, vector<1x128xf32>
    %13 = vector.broadcast %12 : vector<1x128xf32> to vector<16x128xf32>
    %14 = arith.addf %11, %13 : vector<16x128xf32>
    %cst_11 = arith.constant 0.000000e+00 : f32
    %15 = vector.broadcast %cst_11 : f32 to vector<16x128xf32>
    %16 = arith.maximumf %14, %15 : vector<16x128xf32>
    %c0_12 = arith.constant 0 : index
    %c0_13 = arith.constant 0 : index
    %17 = vector.load %arg6[%c0_12, %c0_13] : memref<1x128xf32, #tpu.memory_space<vmem>>, vector<1x128xf32>
    %18 = vector.broadcast %17 : vector<1x128xf32> to vector<16x128xf32>
    %19 = arith.mulf %16, %18 : vector<16x128xf32>
    %cst_14 = arith.constant dense<0.000000e+00> : vector<16xf32>
    %20 = vector.multi_reduction <add>, %19, %cst_14 [1] : vector<16x128xf32> to vector<16xf32>
    %21 = vector.shape_cast %20 : vector<16xf32> to vector<16x1xf32>
    %c0_15 = arith.constant 0 : index
    %c0_16 = arith.constant 0 : index
    %22 = vector.load %arg7[%c0_15, %c0_16] : memref<1x1xf32, #tpu.memory_space<vmem>>, vector<1x1xf32>
    %23 = vector.broadcast %22 : vector<1x1xf32> to vector<16x1xf32>
    %24 = arith.addf %21, %23 : vector<16x1xf32>
    %c0_17 = arith.constant 0 : index
    %c0_18 = arith.constant 0 : index
    %25 = vector.load %arg8[%c0_17, %c0_18] : memref<16x1xf32, #tpu.memory_space<vmem>>, vector<16x1xf32>
    tpu.vector_store %arg8[%c0_17, %c0_18], %24 {strides = array<i32>} : memref<16x1xf32, #tpu.memory_space<vmem>>, vector<16x1xf32>,
    return
  }
  func.func @transform_0(%arg0: i32) -> (i32, i32) {
    %c0_i32 = arith.constant 0 : i32
    %c0_i32_0 = arith.constant 0 : i32
    return %arg0, %c0_i32 : i32, i32
  }
  func.func @transform_1(%arg0: i32) -> (i32, i32) {
    %c0_i32 = arith.constant 0 : i32
    %c0_i32_0 = arith.constant 0 : i32
    %c0_i32_1 = arith.constant 0 : i32
    return %c0_i32, %c0_i32_0 : i32, i32
  }
  func.func @transform_2(%arg0: i32) -> (i32, i32) {
    %c0_i32 = arith.constant 0 : i32
    %c0_i32_0 = arith.constant 0 : i32
    %c0_i32_1 = arith.constant 0 : i32
    return %c0_i32, %c0_i32_0 : i32, i32
  }
  func.func @transform_3(%arg0: i32) -> (i32, i32) {
    %c0_i32 = arith.constant 0 : i32
    %c0_i32_0 = arith.constant 0 : i32
    %c0_i32_1 = arith.constant 0 : i32
    return %c0_i32, %c0_i32_0 : i32, i32
  }
  func.func @transform_4(%arg0: i32) -> (i32, i32) {
    %c0_i32 = arith.constant 0 : i32
    %c0_i32_0 = arith.constant 0 : i32
    %c0_i32_1 = arith.constant 0 : i32
    return %c0_i32, %c0_i32_0 : i32, i32
  }
  func.func @transform_5(%arg0: i32) -> (i32, i32) {
    %c0_i32 = arith.constant 0 : i32
    %c0_i32_0 = arith.constant 0 : i32
    %c0_i32_1 = arith.constant 0 : i32
    return %c0_i32, %c0_i32_0 : i32, i32
  }
  func.func @transform_6(%arg0: i32) -> (i32, i32) {
    %c0_i32 = arith.constant 0 : i32
    %c0_i32_0 = arith.constant 0 : i32
    %c0_i32_1 = arith.constant 0 : i32
    return %c0_i32, %c0_i32_0 : i32, i32
  }
  func.func @transform_7(%arg0: i32) -> (i32, i32) {
    %c0_i32 = arith.constant 0 : i32
    %c0_i32_0 = arith.constant 0 : i32
    return %arg0, %c0_i32 : i32, i32
  }
}

</mosaic_0001>

<bundles_post_ra>
// kernel: gw_network_forward.1
= control target key start
LH: loop header
LB: loop body
LE: loop exit
PB: predicated region body
PF: predicated region fallthrough
CT: control target
= control target key end

     0   :  { %s575_s0 = inlined_call_operand.hbm [shape: f32[8,20], index: 0, kind: input, shape index: {}]   ;;  %s576_s1 = inlined_call_operand.hbm [shape: bf16[20,128], index: 1, kind: input, shape index: {}]   ;;  %s577_s2 = inlined_call_operand.vmem [shape: f32[1,128], index: 2, kind: input, shape index: {}]   ;;  %s578_s3 = inlined_call_operand.hbm [shape: bf16[128,128], index: 3, kind: input, shape index: {}]   ;;  %s579_s4 = inlined_call_operand.vmem [shape: f32[1,128], index: 4, kind: input, shape index: {}]   ;;  %s580_s5 = inlined_call_operand.vmem [shape: f32[1,128], index: 5, kind: input, shape index: {}]   ;;  %s581_s6 = inlined_call_operand.<no memory space> [shape: f32[1,1], index: 6, kind: input, shape index: {}]   ;;  %s582_s7 = inlined_call_operand.vmem [shape: f32[8,1], index: 7, kind: output, shape index: {}]  }
   0x1   :  { %v12_v0 = vstv %s581_s6 }
   0x2   :  { %13 = vst [vmem:[#allocation2] sm:$0x1] %v12_v0 }
   0x3   :  { %14 = vsyncpa [#allocation4], 0 }
   0x4   :  { %15 = vsyncpa [#allocation6], 0 }
   0x5   :  { %20 = vsyncadd [#allocation4], 128  ;;  %s469_s26 = smov [#allocation5]   ;;  %s399_s30 = scalar_lea.hbm %s576_s1, 192 }
   0x6   :  { %s33_s27 = sshll.u32 %s469_s26, 4  ;;  %p400_p0 = scmp.ne.s32.totalorder %s576_s1, %s399_s30  ;;  %s34_s27 = int_to_ptr.vmem [resolvable:$true] %s33_s27 }
   0x7   :  { %p403_p1 = scmp.lt.u32.totalorder %s399_s30, %s576_s1 }
   0x9   :  { %p405_p2 = pnand %p403_p1, %p400_p0 }
   0xb   :  { %408 = shalt.err (!%p405_p2)
}
   0xc   :  { %s409_s6 = scalar_lea.vmem %s34_s27, 192  ;;  %p414_p4 = scmp.lt.s32.totalorder %s34_s27, %s34_s27 }
   0xd   :  { %p410_p3 = scmp.ne.s32.totalorder %s34_s27, %s409_s6  ;;  %p415_p5 = scmp.lt.s32.totalorder %s409_s6, %s409_s6 }
   0xf   :  { %p416_p6 = por %p415_p5, %p414_p4 }
  0x11   :  { %p417_p7 = pnand %p416_p6, %p410_p3 }
  0x13   :  { %420 = shalt.err (!%p417_p7)
}
  0x14   :  { %s470_s12 = smov 64   ;;  %s471_s13 = smov 4  }
  0x15   :  { %39 = dma.hbm_to_vmem [thread:$0]  %s576_s1, 192, %s34_s27, [#allocation6], %s470_s12, %s470_s12, %s471_s13  }
  0x16   :  { %s472_s16 = smov [#allocation3]   ;;  %s421_s20 = scalar_lea.hbm %s575_s0, 128 }
  0x17   :  { %s21_s17 = sshll.u32 %s472_s16, 4  ;;  %p422_p8 = scmp.ne.s32.totalorder %s575_s0, %s421_s20  ;;  %s22_s17 = int_to_ptr.vmem [resolvable:$true] %s21_s17 }
  0x18   :  { %p425_p9 = scmp.lt.u32.totalorder %s421_s20, %s575_s0 }
  0x1a   :  { %p427_p10 = pnand %p425_p9, %p422_p8 }
  0x1c   :  { %430 = shalt.err (!%p427_p10)
}
  0x1d   :  { %s431_s25 = scalar_lea.vmem %s22_s17, 128  ;;  %s435_s1 = scalar_lea.vmem %s22_s17, 256 }
  0x1e   :  { %p432_p11 = scmp.ne.s32.totalorder %s22_s17, %s431_s25  ;;  %p436_p12 = scmp.lt.s32.totalorder %s22_s17, %s22_s17 }
  0x1f   :  { %p437_p13 = scmp.lt.s32.totalorder %s435_s1, %s431_s25 }
  0x21   :  { %p438_p0 = por %p437_p13, %p436_p12 }
  0x23   :  { %p439_p1 = pnand %p438_p0, %p432_p11 }
  0x25   :  { %442 = shalt.err (!%p439_p1)
}
  0x26   :  { %s473_s26 = smov 128   ;;  %s474_s27 = smov 8  }
  0x27   :  { %27 = dma.hbm_to_vmem [thread:$0]  %s575_s0, 128, %s22_s17, [#allocation4], %s473_s26, %s473_s26, %s474_s27  }
  0x28   :  { %s475_s30 = smov [#allocation7]   ;;  %s443_s11 = scalar_lea.hbm %s578_s3, 1024 }
  0x29   :  { %s47_s8 = sshll.u32 %s475_s30, 4  ;;  %p444_p2 = scmp.ne.s32.totalorder %s578_s3, %s443_s11  ;;  %s48_s8 = int_to_ptr.vmem [resolvable:$true] %s47_s8 }
  0x2a   :  { %p447_p3 = scmp.lt.u32.totalorder %s443_s11, %s578_s3 }
  0x2c   :  { %p449_p4 = pnand %p447_p3, %p444_p2 }
  0x2e   :  { %452 = shalt.err (!%p449_p4)
}
  0x2f   :  { %s453_s18 = scalar_lea.vmem %s48_s8, 1024  ;;  %p458_p6 = scmp.lt.s32.totalorder %s48_s8, %s48_s8 }
  0x30   :  { %p454_p5 = scmp.ne.s32.totalorder %s48_s8, %s453_s18  ;;  %p459_p7 = scmp.lt.s32.totalorder %s453_s18, %s453_s18 }
  0x32   :  { %p460_p8 = por %p459_p7, %p458_p6 }
  0x34   :  { %p461_p9 = pnand %p460_p8, %p454_p5 }
  0x36   :  { %464 = shalt.err (!%p461_p9)
}
  0x37   :  { %53 = dma.hbm_to_vmem [thread:$0]  %s578_s3, 1024, %s48_s8, [#allocation6], %s470_s12, %s470_s12, %s471_s13  }
  0x38   :  { %465 = dma.done.wait [#allocation4], 256  }
  0x39   :  { %466 = vsyncadd [#allocation4], 4294967040 }
  0x3a   :  { %467 = dma.done.wait [#allocation6], 1216  }
  0x3b   :  { %468 = vsyncadd [#allocation6], 4294966080  ;;  %v476_v1 = vmov 0.0   ;;  %vm477_vm0 = vmmov 0   ;;  %v389_v2 = vld [vmem:[#allocation5] sm:$0xff]   ;;  %vm96_vm1 = vcmask 1041408  }
  0x3c   :  { %352 = vmatprep.subr.bf16.mxu0 %v476_v1  ;;  %356 = vmatprep.mubr.msk.bf16.mxu0 %vm477_vm0, %v476_v1  ;;  %v390_v3 = vld [vmem:[#allocation5 + $0x8] ss:$0 sps:$4 sm:$0x33]   ;;  %v70_v4 = vld [vmem:[#allocation3] sm:$0xff]  ;;  %v71_v5 = vld [vmem:[#allocation3 + $0x8] sm:$0xff]  ;;  %vm92_vm2 = vcmask 162816  }
  0x3d   :  { %360 = vmatprep.subr.bf16.mxu1 %v476_v1  ;;  %376 = vmatprep.mubr.msk.bf16.mxu1 %vm477_vm0, %v476_v1  ;;  %v98_v6 = vsel %vm96_vm1, %v390_v3, 0  ;;  %v391_v7 = vld [vmem:[#allocation7] sm:$0xff]   ;;  %v72_v8 = vpack.c.bf16 %v71_v5, %v70_v4  ;;  %v392_v9 = vld [vmem:[#allocation7 + $0x8] sm:$0xff]   ;;  %v393_v10 = vld [vmem:[#allocation7 + $0x10] sm:$0xff]   ;;  %vm280_vm3 = vcmask 7168  }
  0x3e   :  { %353 = vmatpush3.bf16.msra.mxu0 %v389_v2  ;;  %361 = vmatpush3.bf16.msra.mxu1 %v391_v7  ;;  %v394_v11 = vld [vmem:[#allocation7 + $0x18] sm:$0xff]   ;;  %v395_v12 = vld [vmem:[#allocation7 + $0x20] sm:$0xff]   ;;  %v396_v13 = vld [vmem:[#allocation7 + $0x28] sm:$0xff]  }
  0x3f   :  { %354 = vmatprep.subr.bf16.mxu0 %v476_v1  ;;  %362 = vmatprep.subr.bf16.mxu1 %v476_v1  ;;  %v397_v14 = vld [vmem:[#allocation7 + $0x30] sm:$0xff]   ;;  %v398_v15 = vld [vmem:[#allocation7 + $0x38] sm:$0xff]   ;;  %v325_v16 = vld [vmem:[%s577_s2] ss:$0 sm:$0xff] }
  0x40   :  { %v329_v26 = vld [vmem:[%s579_s4] ss:$0 sm:$0xff] }
  0x41   :  { %v338_v31 = vld [vmem:[%s580_s5] ss:$0 sm:$0xff] }
  0x42   :  { %355 = vmatpush3.bf16.msra.mxu0 %v98_v6  ;;  %363 = vmatpush3.bf16.msra.mxu1 %v392_v9  ;;  %v339_v38 = vld [vmem:[#allocation2] ss:$0 sm:$0xff] }
  0x43   :  { %364 = vmatprep.subr.bf16.mxu1 %v476_v1 }
  0x45   :  { %357 = vmatmul.mubr.msk.bf16.vlgmr.msra.gmra.mrb[0].mxu0 %vm92_vm2, %v72_v8 }
  0x46   :  { %365 = vmatpush3.bf16.msra.mxu1 %v393_v10 }
  0x47   :  { %366 = vmatprep.subr.bf16.mxu1 %v476_v1 }
  0x4a   :  { %367 = vmatpush3.bf16.msra.mxu1 %v394_v11 }
  0x4b   :  { %368 = vmatprep.subr.bf16.mxu1 %v476_v1 }
  0x4e   :  { %369 = vmatpush3.bf16.msra.mxu1 %v395_v12 }
  0x4f   :  { %370 = vmatprep.subr.bf16.mxu1 %v476_v1 }
  0x52   :  { %371 = vmatpush3.bf16.msra.mxu1 %v396_v13 }
  0x53   :  { %372 = vmatprep.subr.bf16.mxu1 %v476_v1 }
  0x56   :  { %373 = vmatpush3.bf16.msra.mxu1 %v397_v14 }
  0x57   :  { %374 = vmatprep.subr.bf16.mxu1 %v476_v1 }
  0x5a   :  { %375 = vmatpush3.bf16.msra.mxu1 %v398_v15 }
 0x118   :  { %v134_v17 = vpop.f32.mrb[0].mxu0 }
 0x119   :  { %v135_v18 = vadd.f32 %v325_v16, %v134_v17  ;;  %v358_v19 = vpop.f32.mrb[1].mxu0 }
 0x11a   :  { %v137_v20 = vpop.f32.mrb[2].mxu0 }
 0x11b   :  { %v138_v21 = vadd.f32 %v325_v16, %v137_v20  ;;  %v359_v22 = vpop.f32.mrb[3].mxu0  ;;  %v141_v23 = vmax.f32 %v135_v18, 0.0 }
 0x11d   :  { %v142_v24 = vmax.f32 %v138_v21, 0.0 }
 0x11f   :  { %v143_v25 = vpack.c.bf16 %v142_v24, %v141_v23 }
 0x121   :  { %377 = vmatmul.mubr.bf16.vlgmr.msra.gmra.mrb[0].mxu1 %v143_v25 }
 0x1f4   :  { %v249_v27 = vpop.f32.mrb[0].mxu1 }
 0x1f5   :  { %v250_v28 = vadd.f32 %v329_v26, %v249_v27  ;;  %v378_v29 = vpop.f32.mrb[1].mxu1 }
 0x1f6   :  { %v252_v30 = vpop.f32.mrb[2].mxu1 }
 0x1f7   :  { %v256_v32 = vmax.f32 %v250_v28, 0.0  ;;  %v253_v33 = vadd.f32 %v329_v26, %v252_v30  ;;  %v379_v34 = vpop.f32.mrb[3].mxu1 }
 0x1f9   :  { %v257_v35 = vmax.f32 %v253_v33, 0.0  ;;  %v265_v36 = vmul.f32 %v338_v31, %v256_v32 }
 0x1fb   :  { %267 = vadd.xlane.f32.xlu0 %v265_v36  ;;  %v266_v37 = vmul.f32 %v338_v31, %v257_v35 }
 0x1ff   :  { %269 = vadd.xlane.f32.xlu0 %v266_v37 }
 0x288   :  { %v268_v39 = vpop.xlane.xlu0 %267 }
 0x289   :  { %v278_v40 = vadd.f32 %v339_v38, %v268_v39 }
 0x28b   :  { %281 = vst.msk [vmem:[#allocation8] sm:$0xff] %vm280_vm3, %v278_v40 }
 0x28c   :  { %v270_v41 = vpop.xlane.xlu0 %269 }
 0x292   :  { %v312_v42 = vld [vmem:[#allocation8] sm:$0xff] }
 0x293   :  { %313 = vst [vmem:[%s582_s7] sm:$0xff] %v312_v42 }
 0x294   :  { %319 = vsyncpa [#allocation4], 1 }
 0x295   :  { %320 = vsyncpa [#allocation6], 1 }

</bundles_post_ra>
